<compile_context>
chip_gen: v7x
topology: tpu7x:2x2x1
jax: 0.10.0
libtpu: 0.0.40
codegen_flags: <defaults>
</compile_context>

<pallas_src>
import jax
import jax.numpy as jnp
from jax import lax
from jax.experimental import pallas as pl
from jax.experimental.pallas import tpu as pltpu


# ----------------------------- small helpers -----------------------------

_GEMM_TILES = (512, 256, 128, 64, 32, 16, 8)
_ELEM_TILES = (2048, 1024, 512, 256, 128, 64, 32, 16, 8)
_VMEM_LIMIT = 48 * 1024 * 1024   # explicit budget: fits v7x (64 MiB) and v5e/v6e


def _round_up(x, m):
    return ((x + m - 1) // m) * m


def _pick_tile(m, candidates):
    """Largest candidate dividing m that still leaves >=2 grid steps
    (v7x megacore); fall back to the largest divisor, then to one full block."""
    divisors = [t for t in candidates if m % t == 0]
    for t in divisors:
        if m // t >= 2:
            return t
    return divisors[0] if divisors else m


def im2col(xp_nhwc, kh, kw, stride=1):
    """Patch extraction on an already-padded NHWC tensor -> (N*Ho*Wo, kh*kw*C).
    Column (K) order is (dy, dx, channel) with channel fastest."""
    n, hp, wp, c = xp_nhwc.shape
    ho = (hp - kh) // stride + 1
    wo = (wp - kw) // stride + 1
    cols = []
    for i in range(kh):
        for j in range(kw):
            cols.append(
                xp_nhwc[:, i:i + stride * (ho - 1) + 1:stride,
                        j:j + stride * (wo - 1) + 1:stride, :])
    patches = jnp.concatenate(cols, axis=-1)
    return patches.reshape(n * ho * wo, kh * kw * c), (n, ho, wo)


def conv_weight_to_mat(w):
    """Conv2d weight (Cout, Cin, kh, kw) -> GEMM matrix (kh*kw*Cin, Cout)."""
    cout, cin, kh, kw = w.shape
    return jnp.transpose(w, (2, 3, 1, 0)).reshape(kh * kw * cin, cout)


def build_subpixel_weight(conv1_w, skip_w):
    """Sub-pixel decomposition of ConvTranspose2d(k=4, s=2, p=1), with conv1 and
    skip fused along the output-column axis.

    The GEMM uses 3x3 stride-1 patches of the 1-padded input. Output phase
    (a, b) in {0,1}^2 (i.e. output pixel (2i+a, 2j+b)) only sees taps
    dy in {a, a+1}, dx in {b, b+1}, with 4x4 kernel index (3+a-2dy, 3+b-2dx).
    Column order: (a, b, group[conv1 | skip], cout)."""
    cin, cout, _, _ = conv1_w.shape
    wb = jnp.zeros((3, 3, cin, 2, 2, 2, cout), jnp.float32)
    for a in (0, 1):
        for b in (0, 1):
            for dy in (a, a + 1):
                for dx in (b, b + 1):
                    ky = 3 + a - 2 * dy
                    kx = 3 + b - 2 * dx
                    wb = wb.at[dy, dx, :, a, b, 0, :].set(conv1_w[:, :, ky, kx])
                    wb = wb.at[dy, dx, :, a, b, 1, :].set(skip_w[:, :, ky, kx])
    return wb.reshape(9 * cin, 8 * cout)


def spectral_normalize(w, dim, key, n_iter=1, eps=1e-12):
    """One power iteration, like torch.nn.utils.spectral_norm.
    # TODO(synk): torch persists the power-iteration vector u across forwards;
    # here a fresh u is drawn, which matches a single forward in expectation only."""
    perm = (dim,) + tuple(i for i in range(w.ndim) if i != dim)
    wmat = jnp.transpose(w, perm).reshape(w.shape[dim], -1)
    u = jax.random.normal(key, (wmat.shape[0],), jnp.float32)
    u = u / (jnp.linalg.norm(u) + eps)
    v = None
    for _ in range(n_iter):
        v = wmat.T @ u
        v = v / (jnp.linalg.norm(v) + eps)
        u = wmat @ v
        u = u / (jnp.linalg.norm(u) + eps)
    sigma = u @ (wmat @ v)
    return w / sigma


# ----------------------------- Pallas kernels -----------------------------

def _gemm_stats_kernel(p_ref, w_ref, o_ref, s_ref, sq_ref):
    """GEMM block (bf16 operands, f32 accumulate) with a fused stats epilogue:
    per-column sum and sum-of-squares are accumulated while the output tile is
    still in VMEM (no separate HBM stats pass)."""
    y = jnp.dot(p_ref[...], w_ref[...], preferred_element_type=jnp.float32)
    o_ref[...] = y

    @pl.when(pl.program_id(1) == 0)
    def _():
        s_ref[...] = jnp.zeros_like(s_ref)
        sq_ref[...] = jnp.zeros_like(sq_ref)

    tm, c = y.shape
    if tm % 8 == 0:
        # Fold rows 8-at-a-time with pure VPU adds (no cross-sublane XLU
        # reduce, no masked single-row stores); the final 8-row fold is done
        # once in the wrapper.
        s_ref[...] += jnp.sum(y.reshape(tm // 8, 8, c), axis=0)
        sq_ref[...] += jnp.sum((y * y).reshape(tm // 8, 8, c), axis=0)
    else:
        s_ref[0:1, :] += jnp.sum(y, axis=0, keepdims=True)
        sq_ref[0:1, :] += jnp.sum(y * y, axis=0, keepdims=True)


def _bn_relu_kernel(y_ref, scale_ref, shift_ref, o_ref):
    o_ref[...] = jnp.maximum(
        y_ref[...] * scale_ref[...] + shift_ref[...], 0.0).astype(o_ref.dtype)


def _bn_add_relu_kernel(y_ref, scale_ref, shift_ref, skip_ref, o_ref):
    o_ref[...] = jnp.maximum(
        y_ref[...] * scale_ref[...] + shift_ref[...] + skip_ref[...],
        0.0).astype(o_ref.dtype)


# ----------------------------- kernel wrappers -----------------------------

def conv_gemm_stats(patches, wmat):
    """(M, K) @ (K, C) -> (M, C) f32 plus per-column sum / sum-of-squares.

    Grid is (parallel, arbitrary): the outer 2-way split keeps both v7x
    TensorCores busy, the inner axis revisits per-half stats accumulators.
    # TODO(synk): C is kept as one column block (fine for SAGAN channel counts);
    # very large fused channel counts would want an extra column grid axis."""
    m, k = patches.shape
    c = wmat.shape[1]
    tm = _pick_tile(m, _GEMM_TILES)
    nblk = m // tm
    if nblk >= 2 and nblk % 2 == 0:
        outer, inner = 2, nblk // 2
    else:
        outer, inner = 1, nblk

    def data_map(p, i):
        return (p * inner + i, 0)

    y, s, sq = pl.pallas_call(
        _gemm_stats_kernel,
        out_shape=(jax.ShapeDtypeStruct((m, c), jnp.float32),
                   jax.ShapeDtypeStruct((8 * outer, c), jnp.float32),
                   jax.ShapeDtypeStruct((8 * outer, c), jnp.float32)),
        grid_spec=pltpu.PrefetchScalarGridSpec(
            num_scalar_prefetch=0,
            grid=(outer, inner),
            in_specs=[pl.BlockSpec((tm, k), data_map),
                      pl.BlockSpec((k, c), lambda p, i: (0, 0))],
            out_specs=(pl.BlockSpec((tm, c), data_map),
                       pl.BlockSpec((8, c), lambda p, i: (p, 0)),
                       pl.BlockSpec((8, c), lambda p, i: (p, 0))),
        ),
        compiler_params=pltpu.CompilerParams(
            dimension_semantics=("parallel", "arbitrary"),
            vmem_limit_bytes=_VMEM_LIMIT),
    )(patches, wmat)
    return y, jnp.sum(s, axis=0), jnp.sum(sq, axis=0)


def bn_act(y, scale, shift, skip=None, out_dtype=jnp.float32):
    """Fused per-channel affine (+ optional residual add) + ReLU.

    When 128 % C == 0 the (M, C) slab is viewed as a lane-dense (M*C/128, 128)
    slab (scale/shift tiled across the lane axis) so every store uses all 128
    lanes; otherwise falls back to the (M, C) layout."""
    m, c = y.shape
    if 128 % c == 0 and (m * c) % (128 * 8) == 0:
        rows, width = (m * c) // 128, 128
        rep = 128 // c
        y2 = y.reshape(rows, width)
        sc = jnp.tile(scale, rep)[None, :]
        sh = jnp.tile(shift, rep)[None, :]
        sk = None if skip is None else skip.reshape(rows, width)
    else:
        rows, width = m, c
        y2, sc, sh, sk = y, scale[None, :], shift[None, :], skip

    tr = _pick_tile(rows, _ELEM_TILES)
    row_spec = pl.BlockSpec((tr, width), lambda i: (i, 0))
    vec_spec = pl.BlockSpec((1, width), lambda i: (0, 0))
    if sk is None:
        kernel = _bn_relu_kernel
        in_specs = [row_spec, vec_spec, vec_spec]
        args = (y2, sc, sh)
    else:
        kernel = _bn_add_relu_kernel
        in_specs = [row_spec, vec_spec, vec_spec, row_spec]
        args = (y2, sc, sh, sk)

    out = pl.pallas_call(
        kernel,
        out_shape=jax.ShapeDtypeStruct((rows, width), out_dtype),
        grid_spec=pltpu.PrefetchScalarGridSpec(
            num_scalar_prefetch=0,
            grid=(rows // tr,),
            in_specs=in_specs,
            out_specs=row_spec,
        ),
        compiler_params=pltpu.CompilerParams(
            dimension_semantics=("parallel",),
            vmem_limit_bytes=_VMEM_LIMIT),
    )(*args)
    return out.reshape(m, c)


# ----------------------------- forward pass -----------------------------

def res_block_up(x_nchw, params, eps=1e-5, gemm_dtype=jnp.bfloat16):
    """Matches ResBlockUp.forward (BatchNorm in training mode, batch stats)."""
    n, cin, h, w = x_nchw.shape
    cout = params["conv1_w"].shape[1]
    ho, wo = 2 * h, 2 * w
    # bf16 before im2col: halves the HBM traffic of the patch slab; numerically
    # identical to casting the patches afterwards (GEMM operands were bf16).
    x_nhwc = jnp.transpose(x_nchw, (0, 2, 3, 1)).astype(gemm_dtype)

    # --- stage 1: fused ConvT(conv1) + ConvT(skip) as one sub-pixel GEMM ---
    xp = jnp.pad(x_nhwc, ((0, 0), (1, 1), (1, 1), (0, 0)))
    patches1, _ = im2col(xp, 3, 3, 1)                         # (N*H*W, 9*Cin) bf16
    w_big = build_subpixel_weight(params["conv1_w"], params["skip_w"])
    cp1 = _round_up(w_big.shape[1], 128)                      # lane-dense GEMM output
    if cp1 > w_big.shape[1]:
        w_big = jnp.pad(w_big, ((0, 0), (0, cp1 - w_big.shape[1])))
    # conv1/skip biases are NOT applied here: conv1's cancels in BN1, skip's is
    # folded into the final fused shift.
    ybig, s1, sq1 = conv_gemm_stats(patches1, w_big.astype(gemm_dtype))
    m1 = patches1.shape[0]

    # de-interleave the 4 sub-pixel phases -> (N, 2H, 2W, [conv1|skip], Cout)
    ylarge = ybig[:, :8 * cout].reshape(n, h, w, 2, 2, 2, cout)
    ylarge = jnp.transpose(ylarge, (0, 1, 3, 2, 4, 5, 6)).reshape(n, ho, wo, 2, cout)
    y1 = ylarge[..., 0, :].reshape(n * ho * wo, cout)
    yskip = ylarge[..., 1, :].reshape(n * ho * wo, cout)

    # conv1 batch statistics: combine the 4 phase groups from the GEMM epilogue
    m_total = 4 * m1                                          # = N * 2H * 2W
    s1c = s1[:8 * cout].reshape(2, 2, 2, cout)[:, :, 0, :].sum(axis=(0, 1))
    sq1c = sq1[:8 * cout].reshape(2, 2, 2, cout)[:, :, 0, :].sum(axis=(0, 1))
    mean1 = s1c / m_total
    var1 = jnp.maximum(sq1c / m_total - mean1 * mean1, 0.0)
    scale1 = params["bn1_gamma"] / jnp.sqrt(var1 + eps)
    shift1 = params["bn1_beta"] - mean1 * scale1

    # bn1 + ReLU (lane-dense fused elementwise pass); bf16 output feeds the
    # bf16 stage-2 GEMM, so the 9x im2col duplication is done on bf16 data.
    h1 = bn_act(y1, scale1, shift1, out_dtype=gemm_dtype)     # (M2, Cout) bf16

    # --- stage 2: conv2 (3x3, stride 1, pad 1) ---
    # TODO(synk): conv2 patches are still materialized via im2col in the wrapper
    # (9x duplication of h1); a direct in-kernel 9-tap accumulation would remove it.
    h1p = jnp.pad(h1.reshape(n, ho, wo, cout), ((0, 0), (1, 1), (1, 1), (0, 0)))
    patches2, _ = im2col(h1p, 3, 3, 1)                        # (M2, 9*Cout) bf16
    w2 = conv_weight_to_mat(params["conv2_w"])                # bias dropped (cancels in BN2)
    y2, s2, sq2 = conv_gemm_stats(patches2, w2.astype(gemm_dtype))

    m2 = n * ho * wo
    mean2 = s2 / m2
    var2 = jnp.maximum(sq2 / m2 - mean2 * mean2, 0.0)
    scale2 = params["bn2_gamma"] / jnp.sqrt(var2 + eps)
    # skip bias folded into the shift of the final fused pass
    shift2 = params["bn2_beta"] - mean2 * scale2 + params["skip_b"]

    # bn2 + residual add + ReLU (lane-dense fused elementwise pass)
    out = bn_act(y2, scale2, shift2, skip=yskip, out_dtype=jnp.float32)
    out_nhwc = out.reshape(n, ho, wo, cout)
    return jnp.transpose(out_nhwc, (0, 3, 1, 2))


# ----------------------------- pure-JAX reference -----------------------------

def ref_forward(x, p, eps=1e-5):
    prec = lax.Precision.HIGHEST

    def convT(xx, w, b):
        wk = jnp.transpose(w[:, :, ::-1, ::-1], (1, 0, 2, 3))
        y = lax.conv_general_dilated(
            xx, wk, window_strides=(1, 1), padding=((2, 2), (2, 2)),
            lhs_dilation=(2, 2), dimension_numbers=("NCHW", "OIHW", "NCHW"),
            precision=prec)
        return y + b[None, :, None, None]

    def conv(xx, w, b):
        y = lax.conv_general_dilated(
            xx, w, window_strides=(1, 1), padding=((1, 1), (1, 1)),
            dimension_numbers=("NCHW", "OIHW", "NCHW"), precision=prec)
        return y + b[None, :, None, None]

    def bn(xx, g, be):
        mean = xx.mean(axis=(0, 2, 3), keepdims=True)
        var = xx.var(axis=(0, 2, 3), keepdims=True)
        return ((xx - mean) / jnp.sqrt(var + eps)) * g[None, :, None, None] \
            + be[None, :, None, None]

    skip = convT(x, p["skip_w"], p["skip_b"])
    h = jax.nn.relu(bn(convT(x, p["conv1_w"], p["conv1_b"]),
                       p["bn1_gamma"], p["bn1_beta"]))
    h = bn(conv(h, p["conv2_w"], p["conv2_b"]), p["bn2_gamma"], p["bn2_beta"])
    return jax.nn.relu(h + skip)


# ----------------------------- main -----------------------------

if __name__ == "__main__":
    in_ch, out_ch = 4, 8
    batch, spatial = 2, 16           # output spatial = 32

    key = jax.random.PRNGKey(0)
    ks = jax.random.split(key, 10)

    conv1_w = 0.1 * jax.random.normal(ks[0], (in_ch, out_ch, 4, 4), jnp.float32)
    conv1_b = 0.1 * jax.random.normal(ks[1], (out_ch,), jnp.float32)
    conv2_w = 0.1 * jax.random.normal(ks[2], (out_ch, out_ch, 3, 3), jnp.float32)
    conv2_b = 0.1 * jax.random.normal(ks[3], (out_ch,), jnp.float32)
    skip_w = 0.1 * jax.random.normal(ks[4], (in_ch, out_ch, 4, 4), jnp.float32)
    skip_b = 0.1 * jax.random.normal(ks[5], (out_ch,), jnp.float32)

    # spectral_norm: dim=1 for ConvTranspose2d, dim=0 for Conv2d (PyTorch defaults)
    params = {
        "conv1_w": spectral_normalize(conv1_w, dim=1, key=ks[6]),
        "conv1_b": conv1_b,
        "conv2_w": spectral_normalize(conv2_w, dim=0, key=ks[7]),
        "conv2_b": conv2_b,
        "skip_w": spectral_normalize(skip_w, dim=1, key=ks[8]),
        "skip_b": skip_b,
        "bn1_gamma": jnp.ones((out_ch,), jnp.float32),
        "bn1_beta": jnp.zeros((out_ch,), jnp.float32),
        "bn2_gamma": jnp.ones((out_ch,), jnp.float32),
        "bn2_beta": jnp.zeros((out_ch,), jnp.float32),
    }

    x = jax.random.normal(ks[9], (batch, in_ch, spatial, spatial), jnp.float32)

    out = jax.block_until_ready(res_block_up(x, params))
    ref = jax.block_until_ready(ref_forward(x, params))

    assert out.shape == (batch, out_ch, 2 * spatial, 2 * spatial), out.shape
    max_diff = float(jnp.max(jnp.abs(out - ref)))
    mean_diff = float(jnp.mean(jnp.abs(out - ref)))
    # bf16 MXU operands vs f32 (HIGHEST-precision) reference -> relaxed tolerance
    assert max_diff < 1e-1, f"max abs diff vs reference too large: {max_diff}"
    assert mean_diff < 1e-2, f"mean abs diff vs reference too large: {mean_diff}"

    print("KERNEL_OK")
</pallas_src>

<mosaic_0001>
module attributes {stable_mosaic.version = 11 : i64} {
  func.func @_gemm_stats_kernel(%arg0: i32, %arg1: i32, %arg2: memref<256x36xbf16, #tpu.memory_space<vmem>>, %arg3: memref<36x128xbf16, #tpu.memory_space<vmem>>, %arg4: memref<256x128xf32, #tpu.memory_space<vmem>>, %arg5: memref<8x128xf32, #tpu.memory_space<vmem>>, %arg6: memref<8x128xf32, #tpu.memory_space<vmem>>) attributes {dimension_semantics = [#tpu.dimension_semantics<parallel>, #tpu.dimension_semantics<arbitrary>], iteration_bounds = array<i64: 2, 1>, scalar_prefetch = 0 : i64, scratch_operands = 0 : i64, tpu.core_type = #tpu.core_type<tc>, window_params = [{transform_indices = @transform_0, window_bounds = array<i64: 256, 36>}, {pipeline_mode = #tpu.pipeline_mode<synchronous>, transform_indices = @transform_1, window_bounds = array<i64: 36, 128>}, {transform_indices = @transform_2, window_bounds = array<i64: 256, 128>}, {transform_indices = @transform_3, window_bounds = array<i64: 8, 128>}, {transform_indices = @transform_4, window_bounds = array<i64: 8, 128>}]} {
    %c0 = arith.constant 0 : index
    %c0_0 = arith.constant 0 : index
    %0 = vector.load %arg2[%c0, %c0_0] : memref<256x36xbf16, #tpu.memory_space<vmem>>, vector<256x36xbf16>
    %c0_1 = arith.constant 0 : index
    %c0_2 = arith.constant 0 : index
    %1 = vector.load %arg3[%c0_1, %c0_2] : memref<36x128xbf16, #tpu.memory_space<vmem>>, vector<36x128xbf16>
    %cst = arith.constant dense<0.000000e+00> : vector<256x128xf32>
    %2 = tpu.matmul %0, %1, %cst {dimension_numbers = #tpu.dot_dimension_numbers<[1], [0], [0], [1], [0, 0, 1, 1], [], []>} : vector<256x36xbf16>, vector<36x128xbf16>, vector<256x128xf32> -> vector<256x128xf32>
    %c0_3 = arith.constant 0 : index
    %c0_4 = arith.constant 0 : index
    %3 = vector.load %arg4[%c0_3, %c0_4] : memref<256x128xf32, #tpu.memory_space<vmem>>, vector<256x128xf32>
    tpu.vector_store %arg4[%c0_3, %c0_4], %2 {strides = array<i32>} : memref<256x128xf32, #tpu.memory_space<vmem>>, vector<256x128xf32>,
    %c0_i32 = arith.constant 0 : i32
    %4 = arith.cmpi eq, %arg1, %c0_i32 : i32
    %5 = arith.extui %4 : i1 to i32
    %c0_i32_5 = arith.constant 0 : i32
    %6 = arith.cmpi ne, %5, %c0_i32_5 : i32
    scf.if %6 {
      %cst_16 = arith.constant 0.000000e+00 : f32
      %18 = vector.broadcast %cst_16 : f32 to vector<8x128xf32>
      %c0_17 = arith.constant 0 : index
      %c0_18 = arith.constant 0 : index
      %19 = vector.load %arg5[%c0_17, %c0_18] : memref<8x128xf32, #tpu.memory_space<vmem>>, vector<8x128xf32>
      tpu.vector_store %arg5[%c0_17, %c0_18], %18 {strides = array<i32>} : memref<8x128xf32, #tpu.memory_space<vmem>>, vector<8x128xf32>,
      %cst_19 = arith.constant 0.000000e+00 : f32
      %20 = vector.broadcast %cst_19 : f32 to vector<8x128xf32>
      %c0_20 = arith.constant 0 : index
      %c0_21 = arith.constant 0 : index
      %21 = vector.load %arg6[%c0_20, %c0_21] : memref<8x128xf32, #tpu.memory_space<vmem>>, vector<8x128xf32>
      tpu.vector_store %arg6[%c0_20, %c0_21], %20 {strides = array<i32>} : memref<8x128xf32, #tpu.memory_space<vmem>>, vector<8x128xf32>,
    } else {
    }
    %c0_6 = arith.constant 0 : index
    %c0_7 = arith.constant 0 : index
    %7 = vector.load %arg5[%c0_6, %c0_7] : memref<8x128xf32, #tpu.memory_space<vmem>>, vector<8x128xf32>
    %8 = vector.shape_cast %2 : vector<256x128xf32> to vector<32x8x128xf32>
    %cst_8 = arith.constant dense<0.000000e+00> : vector<8x128xf32>
    %9 = vector.multi_reduction <add>, %8, %cst_8 [0] : vector<32x8x128xf32> to vector<8x128xf32>
    %10 = arith.addf %7, %9 : vector<8x128xf32>
    %c0_9 = arith.constant 0 : index
    %c0_10 = arith.constant 0 : index
    %11 = vector.load %arg5[%c0_9, %c0_10] : memref<8x128xf32, #tpu.memory_space<vmem>>, vector<8x128xf32>
    tpu.vector_store %arg5[%c0_9, %c0_10], %10 {strides = array<i32>} : memref<8x128xf32, #tpu.memory_space<vmem>>, vector<8x128xf32>,
    %c0_11 = arith.constant 0 : index
    %c0_12 = arith.constant 0 : index
    %12 = vector.load %arg6[%c0_11, %c0_12] : memref<8x128xf32, #tpu.memory_space<vmem>>, vector<8x128xf32>
    %13 = arith.mulf %2, %2 : vector<256x128xf32>
    %14 = vector.shape_cast %13 : vector<256x128xf32> to vector<32x8x128xf32>
    %cst_13 = arith.constant dense<0.000000e+00> : vector<8x128xf32>
    %15 = vector.multi_reduction <add>, %14, %cst_13 [0] : vector<32x8x128xf32> to vector<8x128xf32>
    %16 = arith.addf %12, %15 : vector<8x128xf32>
    %c0_14 = arith.constant 0 : index
    %c0_15 = arith.constant 0 : index
    %17 = vector.load %arg6[%c0_14, %c0_15] : memref<8x128xf32, #tpu.memory_space<vmem>>, vector<8x128xf32>
    tpu.vector_store %arg6[%c0_14, %c0_15], %16 {strides = array<i32>} : memref<8x128xf32, #tpu.memory_space<vmem>>, vector<8x128xf32>,
    return
  }
  func.func @transform_0(%arg0: i32, %arg1: i32) -> (i32, i32) {
    %c1_i32 = arith.constant 1 : i32
    %0 = arith.muli %arg0, %c1_i32 : i32
    %1 = arith.addi %0, %arg1 : i32
    %c0_i32 = arith.constant 0 : i32
    %c0_i32_0 = arith.constant 0 : i32
    return %1, %c0_i32 : i32, i32
  }
  func.func @transform_1(%arg0: i32, %arg1: i32) -> (i32, i32) {
    %c0_i32 = arith.constant 0 : i32
    %c0_i32_0 = arith.constant 0 : i32
    %c0_i32_1 = arith.constant 0 : i32
    return %c0_i32, %c0_i32_0 : i32, i32
  }
  func.func @transform_2(%arg0: i32, %arg1: i32) -> (i32, i32) {
    %c1_i32 = arith.constant 1 : i32
    %0 = arith.muli %arg0, %c1_i32 : i32
    %1 = arith.addi %0, %arg1 : i32
    %c0_i32 = arith.constant 0 : i32
    %c0_i32_0 = arith.constant 0 : i32
    return %1, %c0_i32 : i32, i32
  }
  func.func @transform_3(%arg0: i32, %arg1: i32) -> (i32, i32) {
    %c0_i32 = arith.constant 0 : i32
    %c0_i32_0 = arith.constant 0 : i32
    return %arg0, %c0_i32 : i32, i32
  }
  func.func @transform_4(%arg0: i32, %arg1: i32) -> (i32, i32) {
    %c0_i32 = arith.constant 0 : i32
    %c0_i32_0 = arith.constant 0 : i32
    return %arg0, %c0_i32 : i32, i32
  }
}

</mosaic_0001>

<bundles_post_ra>
// kernel: tpu_custom_call.1
= control target key start
LH: loop header
LB: loop body
LE: loop exit
PB: predicated region body
PF: predicated region fallthrough
CT: control target
= control target key end

     0   :  { %10 = vsyncpa [#allocation3], 0  ;;  %s1652_s0 = inlined_call_operand.vmem [shape: bf16[512,36], index: 0, kind: input, shape index: {}]   ;;  %s1653_s1 = inlined_call_operand.vmem [shape: bf16[36,128], index: 1, kind: input, shape index: {}]   ;;  %s1654_s2 = inlined_call_operand.hbm [shape: f32[512,128], index: 2, kind: output, shape index: {0}]   ;;  %s1655_s3 = inlined_call_operand.hbm [shape: f32[16,128], index: 3, kind: output, shape index: {1}]   ;;  %s1656_s4 = inlined_call_operand.hbm [shape: f32[16,128], index: 4, kind: output, shape index: {2}]  }
   0x1   :  { %12 = vsyncpa [#allocation3 + $0x1], 0 }
   0x2   :  { %13 = vsyncpa [#allocation5], 0 }
   0x3   :  { %15 = vsyncpa [#allocation5 + $0x1], 0  ;;  %s1284_s15 = smov 0   ;;  %s1286_s16 = smov 0  }
   0x4   :  { %s1288_s17 = smov 0   ;;  %s1290_s18 = smov 0  }
   0x5   :  { %s1292_s19 = smov 0   ;;  %s1294_s20 = smov 0  }
   0x6 LB: > { %s907_s21 = sadd.s32 4294967295, %s1252_s20   ;;  %s908_s22 = sadd.s32 4294967294, %s1252_s20   ;;  %s1252_s20 = sphi %s1294_s20, %s21_s20   ;;  %s1248_s19 = sphi %s1292_s19, %s1663_s19   ;;  %s1244_s18 = sphi %s1290_s18, %s1662_s18   ;;  %s1240_s17 = sphi %s1288_s17, %s1661_s17   ;;  %s1236_s16 = sphi %s1286_s16, %s1660_s16   ;;  %s1232_s15 = sphi %s1284_s15, %s1659_s15  }
   0x7   : > { %s33_s23 = sadd.s32 1, %s1248_s19  ;;  %s91_s24 = sadd.s32 1, %s1240_s17 }
   0x8   : > { %p35_p0 = scmp.ge.s32.totalorder %s33_s23, 2  ;;  %p101_p1 = scmp.ne.s32.totalorder %s1240_s17, %s1236_s16 }
   0x9   : > { %p102_p2 = scmp.eq.s32.totalorder %s907_s21, 1  ;;  %p107_p3 = scmp.ne.s32.totalorder %s1236_s16, %s1232_s15 }
   0xa   : > { %s1665_s23 = smov (%p35_p0, %s33_s23), 0  ;;  %p108_p5 = scmp.eq.s32.totalorder %s908_s22, 1 }
   0xb   : > { %p1326_p4 = por %p102_p2, %p101_p1  ;;  %s88_s26 = ssub.s32 %s1248_s19, %s1665_s23 }
   0xc   : > { %p911_p6 = scmp.ge.s32.totalorder %s1252_s20, 1  ;;  %p89_p7 = scmp.eq.s32.totalorder %s88_s26, 0 }
   0xd   : > { %p1335_p8 = por %p108_p5, %p107_p3  ;;  %p192_p9 = scmp.lt.s32.totalorder %s1252_s20, 3 }
   0xe   : > { %s1341_s28 = scalar_select %p89_p7, %s1240_s17, %s91_s24  }
   0xf   : > { %p193_p10 = pnand %p911_p6, %p192_p9 }
  0x10   : > { %v1095_v0 = vld [vmem:[%s1653_s1] sm:$0xff] (!%p193_p10)   ;;  %v1096_v1 = vld [vmem:[%s1653_s1 + $0x8] sm:$0xff] (!%p193_p10)   ;;  %s915_s7 = sshll.u32 (!%p193_p10), %s1244_s18, 5  ;;  %v1097_v2 = vld [vmem:[%s1653_s1 + $0x10] ss:$0 sps:$4 sm:$0x33] (!%p193_p10)  }
  0x11   : > { %196 = sbr.rel (%p193_p10) target bundleno = 353 (0x161), region = 28  ;;  %981 = vmatprep.subr.bf16.mxu0 (!%p193_p10), %v1095_v0  ;;  %p231_p11 = scmp.lt.s32.totalorder (!%p193_p10), %s915_s7, 63  ;;  %1019 = vmatprep.subr.bf16.mxu1 (!%p193_p10), %v1095_v0  ;;  %vm421_vm0 = vcmask (!%p193_p10), 1041408   ;;  %vm372_vm1 = vcmask (!%p193_p10), 293888  }
  0x12   : > { %982 = vmatpush3.bf16.msra.mxu0 (!%p193_p10), %v1095_v0  ;;  %1022 = vmatpush3.bf16.msra.mxu1 (!%p193_p10), %v1095_v0  ;;  %v423_v3 = vsel (!%p193_p10), %vm421_vm0, %v1097_v2, 0  ;;  %s1391_s14 = sand.u32 (!%p193_p10), 1, %s1236_s16   ;;  %s961_s29 = sshll.u32 (!%p193_p10), %s1244_s18, 12 }
  0x13   : > { %983 = vmatprep.subr.bf16.mxu0 (!%p193_p10), %v1096_v1  ;;  %1020 = vmatprep.subr.bf16.mxu1 (!%p193_p10), %v1096_v1  ;;  %s912_s24 = sshll.u32 (!%p193_p10), %s1391_s14, 8  ;;  %s725_s8 = scalar_lea.sflag (!%p193_p10), [#allocation3], %s1391_s14 }
  0x14   : > { %s1394_s26 = scalar_lea.vmem (!%p193_p10), [#allocation2], %s912_s24 }
  0x15   : > { %s749_s30 = sshll.u32 (!%p193_p10), %s1394_s26, 4  ;;  %s1473_s30 = int_to_ptr.vmem [resolvable:$true] %s749_s30 }
  0x16   : > { %984 = vmatpush3.bf16.msra.mxu0 (!%p193_p10), %v1096_v1  ;;  %1023 = vmatpush3.bf16.msra.mxu1 (!%p193_p10), %v1096_v1  ;;  %s1114_s9 = scalar_lea.vmem (!%p193_p10), %s1473_s30, 4096 }
  0x17   : > { %1025 = vmatprep.subr.msk.bf16.mxu0 (!%p193_p10), %vm421_vm0, %v1097_v2  ;;  %1026 = vmatprep.subr.msk.bf16.mxu1 (!%p193_p10), %vm421_vm0, %v1097_v2  ;;  %p1115_p12 = scmp.ne.s32.totalorder (!%p193_p10), %s1473_s30, %s1114_s9 }
  0x18   : > { %s1667_s7 = smov (!%p231_p11, %s915_s7), 63 }
  0x19   : > { %s916_s10 = sshll.u32 %s1667_s7, 2  ;;  %s1471_s7 = scalar_lea.hbm %s1654_s2, %s961_s29 }
  0x1a   : > { %s1356_s13 = scalar_lea.vmem %s1652_s0, %s916_s10  ;;  %986 = vmatpush3.bf16.msra.mxu0 %v423_v3  ;;  %1024 = vmatpush3.bf16.msra.mxu1 %v423_v3  ;;  %p1116_p13 = pnand %p1115_p12, %p1326_p4 }
  0x1b   : > { %v1098_v4 = vld [vmem:[%s1356_s13] sm:$0xff]   ;;  %v1099_v5 = vld [vmem:[%s1356_s13 + $0x8] sm:$0xff]   ;;  %v1100_v6 = vld [vmem:[%s1356_s13 + $0x10] sm:$0xff]   ;;  %s1254_s10 = smov [#allocation2]  }
  0x1c   : > { %987 = vmatprep.mubr.msk.bf16.mxu0 %vm372_vm1, %v1098_v4  ;;  %v1101_v7 = vld [vmem:[%s1356_s13 + $0x18] sm:$0xff]   ;;  %v1106_v8 = vld [vmem:[%s1356_s13 + $0x40] sm:$0xff]   ;;  %v1107_v9 = vld [vmem:[%s1356_s13 + $0x48] sm:$0xff]   ;;  %p1117_p0 = pneg %p1116_p13  ;;  %s1118_s11 = sshll.u32 %s1254_s10, 4  ;;  %s1119_s11 = int_to_ptr.vmem [resolvable:$false] %s1118_s11 }
  0x1d   : > { %988 = vmatmul.mubr.msk.bf16.vlgmr.msra.gmra.mrb[0].mxu0 %vm372_vm1, %v1099_v5  ;;  %1003 = vmatprep.mubr.msk.bf16.mxu1 %vm372_vm1, %v1106_v8  ;;  %v1108_v10 = vld [vmem:[%s1356_s13 + $0x50] sm:$0xff]   ;;  %v1102_v11 = vld [vmem:[%s1356_s13 + $0x20] sm:$0xff]   ;;  %v1109_v12 = vld [vmem:[%s1356_s13 + $0x58] sm:$0xff]   ;;  %s1120_s12 = scalar_lea.vmem %s1119_s11, 8192  ;;  %p1121_p1 = scmp.lt.s32.totalorder %s1473_s30, %s1119_s11 }
  0x1e   : > { %991 = vmatprep.mubr.msk.bf16.mxu0 %vm372_vm1, %v1100_v6  ;;  %1004 = vmatmul.mubr.msk.bf16.vlgmr.msra.gmra.mrb[0].mxu1 %vm372_vm1, %v1107_v9  ;;  %v1110_v13 = vld [vmem:[%s1356_s13 + $0x60] sm:$0xff]   ;;  %v1103_v14 = vld [vmem:[%s1356_s13 + $0x28] sm:$0xff]   ;;  %v1104_v15 = vld [vmem:[%s1356_s13 + $0x30] sm:$0xff]   ;;  %p1122_p2 = scmp.lt.s32.totalorder %s1120_s12, %s1114_s9 }
  0x1f   : > { %1007 = vmatprep.mubr.msk.bf16.mxu1 %vm372_vm1, %v1108_v10  ;;  %v1111_v16 = vld [vmem:[%s1356_s13 + $0x68] sm:$0xff]   ;;  %v1112_v17 = vld [vmem:[%s1356_s13 + $0x70] sm:$0xff]   ;;  %v1105_v18 = vld [vmem:[%s1356_s13 + $0x38] sm:$0xff]  }
  0x20   : > { %v1113_v19 = vld [vmem:[%s1356_s13 + $0x78] sm:$0xff]   ;;  %p1123_p3 = por %p1122_p2, %p1121_p1 }
  0x22   : > { %p1124_p5 = pnand %p1123_p3, %p1117_p0 }
  0x25   : > { %992 = vmatmul.mubr.msk.bf16.gmra.mrb[4].mxu0 %vm372_vm1, %v1101_v7 }
  0x26   : > { %995 = vmatprep.mubr.msk.bf16.mxu0 %vm372_vm1, %v1102_v11  ;;  %1008 = vmatmul.mubr.msk.bf16.gmra.mrb[4].mxu1 %vm372_vm1, %v1109_v12 }
  0x27   : > { %1011 = vmatprep.mubr.msk.bf16.mxu1 %vm372_vm1, %v1110_v13 }
  0x2d   : > { %996 = vmatmul.mubr.msk.bf16.gmra.mrb[8].mxu0 %vm372_vm1, %v1103_v14 }
  0x2e   : > { %999 = vmatprep.mubr.msk.bf16.mxu0 %vm372_vm1, %v1104_v15  ;;  %1012 = vmatmul.mubr.msk.bf16.gmra.mrb[8].mxu1 %vm372_vm1, %v1111_v16 }
  0x2f   : > { %1015 = vmatprep.mubr.msk.bf16.mxu1 %vm372_vm1, %v1112_v17 }
  0x35   : > { %1000 = vmatmul.mubr.msk.bf16.gmra.mrb[12].mxu0 %vm372_vm1, %v1105_v18 }
  0x36   : > { %1016 = vmatmul.mubr.msk.bf16.gmra.mrb[12].mxu1 %vm372_vm1, %v1113_v19 }
  0xf0   : > { %v989_v20 = vpop.f32.mrb[0].mxu0 }
  0xf1   : > { %588 = vst [vmem:[%s1394_s26 + $0x10] sm:$0xff] %v989_v20  ;;  %v459_v21 = vpop.f32.mrb[1].mxu0  ;;  %v1400_v27 = vpop.f32.mrb[0].mxu1  ;;  %v661_v28 = vmul.f32 %v989_v20, %v989_v20 }
  0xf2   : > { %586 = vst [vmem:[%s1394_s26] sm:$0xff] %v459_v21  ;;  %v990_v22 = vpop.f32.mrb[2].mxu0  ;;  %v659_v24 = vmul.f32 %v459_v21, %v459_v21  ;;  %604 = vst [vmem:[%s1394_s26 + $0x90] sm:$0xff] %v1400_v27  ;;  %v1404_v31 = vpop.f32.mrb[1].mxu1 }
  0xf3   : > { %589 = vst [vmem:[%s1394_s26 + $0x18] sm:$0xff] %v990_v22  ;;  %v462_v23 = vpop.f32.mrb[3].mxu0  ;;  %602 = vst [vmem:[%s1394_s26 + $0x80] sm:$0xff] %v1404_v31  ;;  %v1408_v32 = vpop.f32.mrb[2].mxu1  ;;  %v662_v33 = vmul.f32 %v990_v22, %v990_v22 }
  0xf4   : > { %587 = vst [vmem:[%s1394_s26 + $0x8] sm:$0xff] %v462_v23  ;;  %v625_v25 = vadd.f32 %v462_v23, %v459_v21  ;;  %v660_v26 = vmul.f32 %v462_v23, %v462_v23  ;;  %605 = vst [vmem:[%s1394_s26 + $0x98] sm:$0xff] %v1408_v32  ;;  %v1412_v37 = vpop.f32.mrb[3].mxu1 }
  0xf5   : > { %603 = vst [vmem:[%s1394_s26 + $0x88] sm:$0xff] %v1412_v37 }
  0xf6   : > { %v626_v29 = vadd.f32 %v989_v20, %v625_v25  ;;  %v691_v30 = vadd.f32 %v660_v26, %v659_v24 }
  0xf8   : > { %v692_v34 = vadd.f32 %v691_v30, %v661_v28  ;;  %v993_v35 = vpop.f32.mrb[4].mxu0  ;;  %v627_v36 = vadd.f32 %v990_v22, %v626_v29 }
  0xf9   : > { %592 = vst [vmem:[%s1394_s26 + $0x30] sm:$0xff] %v993_v35  ;;  %v475_v38 = vpop.f32.mrb[5].mxu0  ;;  %v1420_v47 = vpop.f32.mrb[4].mxu1  ;;  %v665_v48 = vmul.f32 %v993_v35, %v993_v35 }
  0xfa   : > { %590 = vst [vmem:[%s1394_s26 + $0x20] sm:$0xff] %v475_v38  ;;  %v628_v39 = vadd.f32 %v627_v36, %v475_v38  ;;  %v663_v40 = vmul.f32 %v475_v38, %v475_v38  ;;  %v693_v41 = vadd.f32 %v692_v34, %v662_v33  ;;  %v994_v42 = vpop.f32.mrb[6].mxu0  ;;  %608 = vst [vmem:[%s1394_s26 + $0xb0] sm:$0xff] %v1420_v47  ;;  %v1424_v51 = vpop.f32.mrb[5].mxu1 }
  0xfb   : > { %593 = vst [vmem:[%s1394_s26 + $0x38] sm:$0xff] %v994_v42  ;;  %v478_v43 = vpop.f32.mrb[7].mxu0  ;;  %606 = vst [vmem:[%s1394_s26 + $0xa0] sm:$0xff] %v1424_v51  ;;  %v1428_v52 = vpop.f32.mrb[6].mxu1  ;;  %v666_v53 = vmul.f32 %v994_v42, %v994_v42 }
  0xfc   : > { %v694_v44 = vadd.f32 %v693_v41, %v663_v40  ;;  %591 = vst [vmem:[%s1394_s26 + $0x28] sm:$0xff] %v478_v43  ;;  %v629_v45 = vadd.f32 %v628_v39, %v478_v43  ;;  %v664_v46 = vmul.f32 %v478_v43, %v478_v43  ;;  %609 = vst [vmem:[%s1394_s26 + $0xb8] sm:$0xff] %v1428_v52  ;;  %v1432_v57 = vpop.f32.mrb[7].mxu1 }
  0xfd   : > { %607 = vst [vmem:[%s1394_s26 + $0xa8] sm:$0xff] %v1432_v57 }
  0xfe   : > { %v630_v49 = vadd.f32 %v993_v35, %v629_v45  ;;  %v695_v50 = vadd.f32 %v694_v44, %v664_v46  ;;  %v675_v35 = vmul.f32 %v1404_v31, %v1404_v31 }
 0x100   : > { %v696_v54 = vadd.f32 %v695_v50, %v665_v48  ;;  %v997_v55 = vpop.f32.mrb[8].mxu0  ;;  %v631_v56 = vadd.f32 %v994_v42, %v630_v49 }
 0x101   : > { %596 = vst [vmem:[%s1394_s26 + $0x50] sm:$0xff] %v997_v55  ;;  %v491_v58 = vpop.f32.mrb[9].mxu0  ;;  %v1440_v3 = vpop.f32.mrb[8].mxu1  ;;  %v669_v4 = vmul.f32 %v997_v55, %v997_v55 }
 0x102   : > { %594 = vst [vmem:[%s1394_s26 + $0x40] sm:$0xff] %v491_v58  ;;  %v632_v59 = vadd.f32 %v631_v56, %v491_v58  ;;  %v667_v60 = vmul.f32 %v491_v58, %v491_v58  ;;  %v697_v61 = vadd.f32 %v696_v54, %v666_v53  ;;  %v998_v62 = vpop.f32.mrb[10].mxu0  ;;  %612 = vst [vmem:[%s1394_s26 + $0xd0] sm:$0xff] %v1440_v3  ;;  %v1444_v7 = vpop.f32.mrb[9].mxu1 }
 0x103   : > { %597 = vst [vmem:[%s1394_s26 + $0x58] sm:$0xff] %v998_v62  ;;  %v494_v63 = vpop.f32.mrb[11].mxu0  ;;  %610 = vst [vmem:[%s1394_s26 + $0xc0] sm:$0xff] %v1444_v7  ;;  %v1448_v8 = vpop.f32.mrb[10].mxu1  ;;  %v670_v9 = vmul.f32 %v998_v62, %v998_v62 }
 0x104   : > { %v698_v0 = vadd.f32 %v697_v61, %v667_v60  ;;  %595 = vst [vmem:[%s1394_s26 + $0x48] sm:$0xff] %v494_v63  ;;  %v633_v1 = vadd.f32 %v632_v59, %v494_v63  ;;  %v668_v2 = vmul.f32 %v494_v63, %v494_v63  ;;  %613 = vst [vmem:[%s1394_s26 + $0xd8] sm:$0xff] %v1448_v8  ;;  %v1452_v13 = vpop.f32.mrb[11].mxu1 }
 0x105   : > { %611 = vst [vmem:[%s1394_s26 + $0xc8] sm:$0xff] %v1452_v13 }
 0x106   : > { %v634_v5 = vadd.f32 %v997_v55, %v633_v1  ;;  %v699_v6 = vadd.f32 %v698_v0, %v668_v2 }
 0x108   : > { %v700_v10 = vadd.f32 %v699_v6, %v669_v4  ;;  %v1001_v11 = vpop.f32.mrb[12].mxu0  ;;  %v635_v12 = vadd.f32 %v998_v62, %v634_v5 }
 0x109   : > { %600 = vst [vmem:[%s1394_s26 + $0x70] sm:$0xff] %v1001_v11  ;;  %v507_v14 = vpop.f32.mrb[13].mxu0  ;;  %v1462_v23 = vpop.f32.mrb[12].mxu1  ;;  %v673_v24 = vmul.f32 %v1001_v11, %v1001_v11 }
 0x10a   : > { %598 = vst [vmem:[%s1394_s26 + $0x60] sm:$0xff] %v507_v14  ;;  %v636_v15 = vadd.f32 %v635_v12, %v507_v14  ;;  %v671_v16 = vmul.f32 %v507_v14, %v507_v14  ;;  %v701_v17 = vadd.f32 %v700_v10, %v670_v9  ;;  %v1002_v18 = vpop.f32.mrb[14].mxu0  ;;  %616 = vst [vmem:[%s1394_s26 + $0xf0] sm:$0xff] %v1462_v23  ;;  %v1466_v28 = vpop.f32.mrb[13].mxu1 }
 0x10b   : > { %601 = vst [vmem:[%s1394_s26 + $0x78] sm:$0xff] %v1002_v18  ;;  %v510_v19 = vpop.f32.mrb[15].mxu0  ;;  %614 = vst [vmem:[%s1394_s26 + $0xe0] sm:$0xff] %v1466_v28  ;;  %v1477_v29 = vpop.f32.mrb[14].mxu1  ;;  %v674_v30 = vmul.f32 %v1002_v18, %v1002_v18 }
 0x10c   : > { %v702_v20 = vadd.f32 %v701_v17, %v671_v16  ;;  %599 = vst [vmem:[%s1394_s26 + $0x68] sm:$0xff] %v510_v19  ;;  %v637_v21 = vadd.f32 %v636_v15, %v510_v19  ;;  %v672_v22 = vmul.f32 %v510_v19, %v510_v19  ;;  %617 = vst [vmem:[%s1394_s26 + $0xf8] sm:$0xff] %v1477_v29  ;;  %v1483_v36 = vpop.f32.mrb[15].mxu1 }
 0x10d   : > { %615 = vst [vmem:[%s1394_s26 + $0xe8] sm:$0xff] %v1483_v36 }
 0x10e   : > { %v638_v25 = vadd.f32 %v1001_v11, %v637_v21  ;;  %v703_v26 = vadd.f32 %v702_v20, %v672_v22 }
 0x110   : > { %v704_v33 = vadd.f32 %v703_v26, %v673_v24  ;;  %v639_v34 = vadd.f32 %v1002_v18, %v638_v25 }
 0x112   : > { %v640_v38 = vadd.f32 %v639_v34, %v1404_v31  ;;  %v705_v39 = vadd.f32 %v704_v33, %v674_v30 }
 0x113   : > { %1127 = shalt.err (!%p1124_p5)
}
 0x114   : > { %s1128_s13 = scalar_lea.hbm %s1471_s7, 4096  ;;  %s1132_s29 = scalar_lea.hbm %s1654_s2, 8192 }
 0x115   : > { %p1129_p6 = scmp.ne.s32.totalorder %s1471_s7, %s1128_s13  ;;  %p1133_p10 = scmp.lt.u32.totalorder %s1471_s7, %s1654_s2 }
 0x116   : > { %p1134_p11 = scmp.lt.u32.totalorder %s1132_s29, %s1128_s13  ;;  %p1136_p13 = scmp.lt.u32.totalorder %s1128_s13, %s1471_s7 }
 0x117   : > { %p1130_p7 = pnand %p1129_p6, %p1326_p4 }
 0x118   : > { %p1135_p12 = por %p1134_p11, %p1133_p10 }
 0x119   : > { %p1131_p9 = pneg %p1130_p7 }
 0x11a   : > { %p1137_p0 = por %p1136_p13, %p1135_p12 }
 0x11c   : > { %p1138_p1 = pnand %p1137_p0, %p1131_p9 }
 0x11e   : > { %1141 = shalt.err (!%p1138_p1)
}
 0x11f   : > { %s1255_s9 = smov 128   ;;  %s1256_s10 = smov 8   ;;  %v706_v31 = vadd.f32 %v705_v39, %v675_v35  ;;  %v641_v40 = vadd.f32 %v640_v38, %v1412_v37  ;;  %v676_v41 = vmul.f32 %v1412_v37, %v1412_v37  ;;  %v677_v42 = vmul.f32 %v1400_v27, %v1400_v27 }
 0x120   : > { %1027 = dma.vmem_to_hbm [thread:$0]  (%p1326_p4), %s1473_s30, 4096, %s1471_s7, %s725_s8, %s1255_s9, %s1255_s9, %s1256_s10   ;;  %v678_v45 = vmul.f32 %v1408_v32, %v1408_v32  ;;  %v679_v49 = vmul.f32 %v1424_v51, %v1424_v51  ;;  %v680_v55 = vmul.f32 %v1432_v57, %v1432_v57  ;;  %v683_v60 = vmul.f32 %v1444_v7, %v1444_v7 }
 0x121   : > { %v642_v43 = vadd.f32 %v1400_v27, %v641_v40  ;;  %v707_v44 = vadd.f32 %v706_v31, %v676_v41  ;;  %v681_v27 = vmul.f32 %v1420_v47, %v1420_v47  ;;  %v685_v0 = vmul.f32 %v1440_v3, %v1440_v3  ;;  %s913_s30 = sshll.u32 %s1391_s14, 3  ;;  %s1557_s7 = sand.u32 1, %s907_s21  }
 0x122   : > { %v686_v2 = vmul.f32 %v1448_v8, %v1448_v8  ;;  %v687_v6 = vmul.f32 %v1466_v28, %v1466_v28  ;;  %v689_v12 = vmul.f32 %v1462_v23, %v1462_v23  ;;  %s957_s14 = sshll.u32 %s1244_s18, 7  ;;  %s221_s8 = scalar_lea.vmem [#allocation4], %s913_s30 }
 0x123   : > { %v708_v46 = vadd.f32 %v707_v44, %v677_v42  ;;  %v643_v48 = vadd.f32 %v1408_v32, %v642_v43  ;;  %v682_v32 = vmul.f32 %v1428_v52, %v1428_v52  ;;  %s765_s11 = sshll.u32 %s221_s8, 4  ;;  %s1563_s12 = scalar_lea.vmem [#allocation6], %s913_s30  ;;  %s1571_s11 = int_to_ptr.vmem [resolvable:$true] %s765_s11 }
 0x124   : > { %s778_s13 = sshll.u32 %s1563_s12, 4  ;;  %s1569_s21 = scalar_lea.hbm %s1655_s3, %s957_s14  ;;  %s1578_s13 = int_to_ptr.vmem [resolvable:$true] %s778_s13 }
 0x125   : > { %v644_v50 = vadd.f32 %v643_v48, %v1424_v51  ;;  %v709_v53 = vadd.f32 %v708_v46, %v678_v45  ;;  %s1576_s5 = scalar_lea.hbm %s1656_s4, %s957_s14  ;;  %s730_s6 = scalar_lea.sflag [#allocation5], %s1557_s7 }
 0x126   : > { %s1142_s9 = scalar_lea.vmem %s1571_s11, 128  ;;  %s1257_s10 = smov [#allocation4]  }
 0x127   : > { %v710_v54 = vadd.f32 %v709_v53, %v679_v49  ;;  %v645_v37 = vadd.f32 %v644_v50, %v1432_v57  ;;  %p1143_p2 = scmp.ne.s32.totalorder %s1571_s11, %s1142_s9  ;;  %s1146_s30 = sshll.u32 %s1257_s10, 4  ;;  %s1147_s30 = int_to_ptr.vmem [resolvable:$false] %s1146_s30 }
 0x128   : > { %s1148_s24 = scalar_lea.vmem %s1147_s30, 256  ;;  %p1149_p6 = scmp.lt.s32.totalorder %s1571_s11, %s1147_s30 }
 0x129   : > { %v646_v56 = vadd.f32 %v1420_v47, %v645_v37  ;;  %v711_v58 = vadd.f32 %v710_v54, %v680_v55  ;;  %v684_v47 = vmul.f32 %v1452_v13, %v1452_v13  ;;  %p1144_p3 = pnand %p1143_p2, %p1326_p4  ;;  %p1150_p7 = scmp.lt.s32.totalorder %s1148_s24, %s1142_s9 }
 0x12b   : > { %v712_v59 = vadd.f32 %v711_v58, %v681_v27  ;;  %v647_v51 = vadd.f32 %v1428_v52, %v646_v56  ;;  %p1145_p5 = pneg %p1144_p3  ;;  %p1151_p9 = por %p1150_p7, %p1149_p6 }
 0x12d   : > { %v648_v61 = vadd.f32 %v647_v51, %v1444_v7  ;;  %v713_v62 = vadd.f32 %v712_v59, %v682_v32  ;;  %p1152_p10 = pnand %p1151_p9, %p1145_p5 }
 0x12f   : > { %v714_v57 = vadd.f32 %v713_v62, %v683_v60  ;;  %v649_v63 = vadd.f32 %v648_v61, %v1452_v13 }
 0x131   : > { %v650_v1 = vadd.f32 %v1440_v3, %v649_v63  ;;  %v715_v52 = vadd.f32 %v714_v57, %v684_v47  ;;  %v688_v3 = vmul.f32 %v1483_v36, %v1483_v36 }
 0x133   : > { %v716_v4 = vadd.f32 %v715_v52, %v685_v0  ;;  %v651_v5 = vadd.f32 %v1448_v8, %v650_v1  ;;  %v690_v8 = vmul.f32 %v1477_v29, %v1477_v29 }
 0x135   : > { %v652_v7 = vadd.f32 %v651_v5, %v1466_v28  ;;  %v717_v9 = vadd.f32 %v716_v4, %v686_v2 }
 0x137   : > { %v718_v10 = vadd.f32 %v717_v9, %v687_v6  ;;  %v653_v11 = vadd.f32 %v652_v7, %v1483_v36 }
 0x139   : > { %v654_v13 = vadd.f32 %v1462_v23, %v653_v11  ;;  %v719_v14 = vadd.f32 %v718_v10, %v688_v3 }
 0x13b   : > { %v655_v15 = vadd.f32 %v1477_v29, %v654_v13  ;;  %v720_v16 = vadd.f32 %v719_v14, %v689_v12 }
 0x13d   : > { %v721_v17 = vadd.f32 %v720_v16, %v690_v8  ;;  %657 = vst [vmem:[%s221_s8] sm:$0xff] %v655_v15 }
 0x13e   : > { %1155 = shalt.err (!%p1152_p10)
}
 0x13f   : > { %s1156_s14 = scalar_lea.hbm %s1569_s21, 128  ;;  %s1160_s18 = scalar_lea.hbm %s1655_s3, 256 }
 0x140   : > { %p1157_p11 = scmp.ne.s32.totalorder %s1569_s21, %s1156_s14  ;;  %p1161_p0 = scmp.lt.u32.totalorder %s1569_s21, %s1655_s3 }
 0x141   : > { %p1162_p1 = scmp.lt.u32.totalorder %s1160_s18, %s1156_s14  ;;  %p1164_p3 = scmp.lt.u32.totalorder %s1156_s14, %s1569_s21 }
 0x142   : > { %p1158_p12 = pnand %p1157_p11, %p1326_p4 }
 0x143   : > { %p1163_p2 = por %p1162_p1, %p1161_p0 }
 0x144   : > { %p1159_p13 = pneg %p1158_p12 }
 0x145   : > { %p1165_p5 = por %p1164_p3, %p1163_p2 }
 0x147   : > { %p1166_p6 = pnand %p1165_p5, %p1159_p13 }
 0x149   : > { %1169 = shalt.err (!%p1166_p6)
}
 0x14a   : > { %1028 = dma.vmem_to_hbm [thread:$0]  (%p1326_p4), %s1571_s11, 128, %s1569_s21, %s730_s6   ;;  %723 = vst [vmem:[%s1563_s12] sm:$0xff] %v721_v17 }
 0x14b   : > { %s1170_s9 = scalar_lea.vmem %s1578_s13, 128  ;;  %s1258_s30 = smov [#allocation6]  }
 0x14c   : > { %p1171_p7 = scmp.ne.s32.totalorder %s1578_s13, %s1170_s9  ;;  %s1174_s24 = sshll.u32 %s1258_s30, 4  ;;  %s1175_s24 = int_to_ptr.vmem [resolvable:$false] %s1174_s24 }
 0x14d   : > { %s1176_s14 = scalar_lea.vmem %s1175_s24, 256  ;;  %p1177_p11 = scmp.lt.s32.totalorder %s1578_s13, %s1175_s24 }
 0x14e   : > { %p1172_p9 = pnand %p1171_p7, %p1326_p4  ;;  %p1178_p12 = scmp.lt.s32.totalorder %s1176_s14, %s1170_s9 }
 0x150   : > { %p1173_p10 = pneg %p1172_p9  ;;  %p1179_p13 = por %p1178_p12, %p1177_p11 }
 0x152   : > { %p1180_p0 = pnand %p1179_p13, %p1173_p10 }
 0x154   : > { %1183 = shalt.err (!%p1180_p0)
}
 0x155   : > { %s1184_s11 = scalar_lea.hbm %s1576_s5, 128  ;;  %s1188_s8 = scalar_lea.hbm %s1656_s4, 256 }
 0x156   : > { %p1185_p1 = scmp.ne.s32.totalorder %s1576_s5, %s1184_s11  ;;  %p1189_p5 = scmp.lt.u32.totalorder %s1576_s5, %s1656_s4 }
 0x157   : > { %p1190_p6 = scmp.lt.u32.totalorder %s1188_s8, %s1184_s11  ;;  %p1192_p9 = scmp.lt.u32.totalorder %s1184_s11, %s1576_s5 }
 0x158   : > { %p1186_p2 = pnand %p1185_p1, %p1326_p4 }
 0x159   : > { %p1191_p7 = por %p1190_p6, %p1189_p5 }
 0x15a   : > { %p1187_p3 = pneg %p1186_p2 }
 0x15b   : > { %p1193_p10 = por %p1192_p9, %p1191_p7 }
 0x15d   : > { %p1194_p11 = pnand %p1193_p10, %p1187_p3 }
 0x15f   : > { %1197 = shalt.err (!%p1194_p11)
}
 0x160   : > { %1029 = dma.vmem_to_hbm [thread:$0]  (%p1326_p4), %s1578_s13, 128, %s1576_s5, %s730_s6  }
 0x161 PF: > { %p1043_p12 = scmp.ge.s32.totalorder %s1252_s20, 2  ;;  %s790_s29 = sand.u32 1, %s1232_s15  }
 0x162   : > { %s791_s10 = scalar_lea.sflag [#allocation3], %s790_s29 }
 0x163   : > { %p1034_p13 = pnand %p1043_p12, %p1335_p8 }
 0x165   : > { %1223 = dma.done.wait (!%p1034_p13), %s791_s10, 4096  }
 0x166   : > { %1225 = vsyncadd (!%p1034_p13), %s791_s10, 4294963200  ;;  %s799_s9 = sand.u32 1, %s908_s22  }
 0x167   : > { %s800_s25 = scalar_lea.sflag [#allocation5], %s799_s9 }
 0x168   : > { %1227 = dma.done.wait (!%p1034_p13), %s800_s25, 256  }
 0x169   : > { %1229 = vsyncadd (!%p1034_p13), %s800_s25, 4294967040  ;;  %s21_s20 = sadd.s32 1, %s1252_s20   ;;  %s1659_s15 = smov %s1236_s16 }
 0x16a   : > { %p18_p4 = scmp.ge.s32.totalorder %s21_s20, 4   ;;  %s1660_s16 = smov %s1240_s17 }
 0x16b   : > { %s1661_s17 = smov %s1341_s28  ;;  %s1662_s18 = smov %s1248_s19 }
 0x16c   : > { %s1663_s19 = smov %s1665_s23  ;;  %20 = sbr.rel (!%p18_p4) target bundleno = 6 (0x6), region = 99 }
 0x173   :  { %814 = vsyncpa [#allocation3], 1 }
 0x174   :  { %816 = vsyncpa [#allocation3 + $0x1], 1 }
 0x175   :  { %817 = vsyncpa [#allocation5], 1 }
 0x176   :  { %819 = vsyncpa [#allocation5 + $0x1], 1 }

</bundles_post_ra>
